<compile_context>
chip_gen: v6e
topology: v6e:2x2x1
jax: 0.10.0
libtpu: 0.0.40
codegen_flags: <defaults>
</compile_context>

<pallas_src>
import jax
import jax.numpy as jnp
from jax.experimental import pallas as pl
from jax.experimental.pallas import tpu as pltpu


def _round_up(n, m):
    return ((n + m - 1) // m) * m


def mlp_kernel(x_ref, w1_ref, b1_ref, w2_ref, b2_ref,
               w3_ref, b3_ref, w4_ref, b4_ref, o_ref):
    # x_ref: (F, TILE_B) in compute dtype -- batch stays on the lane axis for
    # every layer; weights w1..w3 in compute dtype, biases / w4 / b4 in f32.
    # fc1 + ReLU: (64, F) @ (F, TILE_B) -> (64, TILE_B), f32 accumulation.
    h = jnp.dot(w1_ref[...], x_ref[...], preferred_element_type=jnp.float32)
    h = jnp.maximum(h + b1_ref[...], 0.0)            # bias + ReLU in f32
    # fc2 + ReLU: (32, 64) @ (64, TILE_B) -> (32, TILE_B)
    h = jnp.dot(w2_ref[...], h.astype(w2_ref.dtype),
                preferred_element_type=jnp.float32)
    h = jnp.maximum(h + b2_ref[...], 0.0)
    # fc3 + ReLU: (16, 32) @ (32, TILE_B) -> (16, TILE_B)
    h = jnp.dot(w3_ref[...], h.astype(w3_ref.dtype),
                preferred_element_type=jnp.float32)
    h = jnp.maximum(h + b3_ref[...], 0.0)
    # fc4 (16 -> 1): VPU multiply + sublane reduction instead of an N=1 MXU pass.
    out = jnp.sum(h * w4_ref[...], axis=0, keepdims=True) + b4_ref[...]
    o_ref[...] = out.astype(o_ref.dtype)             # (1, TILE_B), lane-dense


def simple_nn_forward(x, params, *, tile_b=16384, compute_dtype=jnp.bfloat16):
    """Forward pass matching PyTorch SimpleNN.

    params = [(w1, b1), ..., (w4, b4)] with w_i of shape (out, in) and b_i of
    shape (out,), i.e. exactly nn.Linear.weight / nn.Linear.bias.
    """
    (w1, b1), (w2, b2), (w3, b3), (w4, b4) = params
    B, F = x.shape
    assert w1.shape[1] == F

    # Batch tile: multiple of 128 (lane width), capped so tiny batches don't
    # over-pad.  With the (F, TILE_B) lane-dense layout even TILE_B=32768 is a
    # small VMEM footprint, so the default 16384 is safe on v5e/v6e/v7x.
    tile_b = _round_up(min(tile_b, _round_up(B, 128)), 128)
    b_pad = _round_up(B, tile_b)
    grid = (b_pad // tile_b,)

    # (B, F) -> (F, B) in the compute dtype: lane-dense, MXU-ready RHS layout.
    # Transpose + cast + tail-pad fuse into one XLA pass producing x^T, so the
    # padding no longer costs a separate HBM rewrite of x.
    x_t = x.T.astype(compute_dtype)
    if b_pad != B:
        x_t = jnp.pad(x_t, ((0, 0), (0, b_pad - B)))

    # bf16 matmul operands (v5e/v6e/v7x MXU-native) halve HBM/DMA bytes for x,
    # the only batch-scaled array; bias-add / ReLU / fc4 reduction stay f32.
    w1_c, w2_c, w3_c = (w.astype(compute_dtype) for w in (w1, w2, w3))
    b1_c = b1.reshape(-1, 1).astype(jnp.float32)
    b2_c = b2.reshape(-1, 1).astype(jnp.float32)
    b3_c = b3.reshape(-1, 1).astype(jnp.float32)
    w4_c = w4.reshape(-1, 1).astype(jnp.float32)     # (16, 1)
    b4_c = b4.reshape(1, 1).astype(jnp.float32)      # (1, 1)

    # Constant index_map: fetched once before the grid loop, VMEM-resident.
    # (Left at default buffering; pl.Buffered(1) would only shave a few KiB.)
    const = lambda shape: pl.BlockSpec(shape, lambda i: (0, 0))

    itemsize = jnp.dtype(compute_dtype).itemsize
    flops = 2 * b_pad * (F * 64 + 64 * 32 + 32 * 16 + 16 * 1)
    weight_bytes = sum(int(a.size) * a.dtype.itemsize
                       for a in (w1_c, b1_c, w2_c, b2_c, w3_c, b3_c, w4_c, b4_c))
    bytes_accessed = b_pad * F * itemsize + b_pad * 4 + weight_bytes

    out = pl.pallas_call(
        mlp_kernel,
        out_shape=jax.ShapeDtypeStruct((1, b_pad), jnp.float32),
        grid=grid,
        in_specs=[
            pl.BlockSpec((F, tile_b), lambda i: (0, i)),  # x^T: pipelined over batch
            const(w1_c.shape), const(b1_c.shape),
            const(w2_c.shape), const(b2_c.shape),
            const(w3_c.shape), const(b3_c.shape),
            const(w4_c.shape), const(b4_c.shape),
        ],
        out_specs=pl.BlockSpec((1, tile_b), lambda i: (0, i)),
        compiler_params=pltpu.CompilerParams(
            # TODO(synk): if profiling shows only one v7x TensorCore busy, switch
            # this axis to pltpu.CORE_PARALLEL (or split it explicitly via core_map).
            dimension_semantics=("parallel",),
            vmem_limit_bytes=32 * 1024 * 1024,
        ),
        cost_estimate=pl.CostEstimate(
            flops=flops, transcendentals=0, bytes_accessed=bytes_accessed),
    )(x_t, w1_c, b1_c, w2_c, b2_c, w3_c, b3_c, w4_c, b4_c)

    # (1, b_pad) contiguous == (b_pad, 1): order-preserving reshape, then drop
    # the padded tail rows.
    return out.reshape(b_pad, 1)[:B]


def init_params(key, in_features):
    # nn.Linear-style init: uniform(-1/sqrt(fan_in), 1/sqrt(fan_in)),
    # weights stored PyTorch-style as (out_features, in_features).
    dims = [(in_features, 64), (64, 32), (32, 16), (16, 1)]
    params = []
    for fan_in, fan_out in dims:
        key, kw, kb = jax.random.split(key, 3)
        bound = 1.0 / float(fan_in) ** 0.5
        w = jax.random.uniform(kw, (fan_out, fan_in), jnp.float32, -bound, bound)
        b = jax.random.uniform(kb, (fan_out,), jnp.float32, -bound, bound)
        params.append((w, b))
    return params


def reference_forward(x, params):
    (w1, b1), (w2, b2), (w3, b3), (w4, b4) = params
    h = jnp.maximum(x @ w1.T + b1, 0.0)
    h = jnp.maximum(h @ w2.T + b2, 0.0)
    h = jnp.maximum(h @ w3.T + b3, 0.0)
    return h @ w4.T + b4


if __name__ == "__main__":
    key = jax.random.PRNGKey(0)
    key, kx = jax.random.split(key)
    batch, in_features = 8, 8          # X_train.shape[1] == 8 in this synthetic setup
    params = init_params(key, in_features)

    # 1) Small-shape sanity check with f32 operands -> tight tolerance vs ref.
    x = jax.random.normal(kx, (batch, in_features), jnp.float32)
    out = jax.block_until_ready(
        simple_nn_forward(x, params, compute_dtype=jnp.float32))
    ref = reference_forward(x, params)
    assert out.shape == (batch, 1)
    assert jnp.allclose(out, ref, atol=1e-5, rtol=1e-5)

    # 2) Exercise the multi-step grid, pipelining and padded tail:
    #    300 rows, 128-row tiles -> 3 grid steps with a padded final tile.
    key, kx2 = jax.random.split(key)
    x2 = jax.random.normal(kx2, (300, in_features), jnp.float32)
    out2 = jax.block_until_ready(
        simple_nn_forward(x2, params, tile_b=128, compute_dtype=jnp.float32))
    ref2 = reference_forward(x2, params)
    assert out2.shape == (300, 1)
    assert jnp.allclose(out2, ref2, atol=1e-5, rtol=1e-5)

    # 3) Default bf16-operand fast path (v5e/v6e/v7x): f32 accumulate, looser tol.
    out3 = jax.block_until_ready(simple_nn_forward(x2, params, tile_b=128))
    assert out3.shape == (300, 1)
    assert jnp.allclose(out3, ref2, atol=5e-2, rtol=5e-2)

    print("KERNEL_OK")
</pallas_src>

<mosaic_0001>
module attributes {stable_mosaic.version = 11 : i64} {
  func.func @mlp_kernel(%arg0: i32, %arg1: memref<8x128xf32, #tpu.memory_space<vmem>>, %arg2: memref<64x8xf32, #tpu.memory_space<vmem>>, %arg3: memref<64x1xf32, #tpu.memory_space<vmem>>, %arg4: memref<32x64xf32, #tpu.memory_space<vmem>>, %arg5: memref<32x1xf32, #tpu.memory_space<vmem>>, %arg6: memref<16x32xf32, #tpu.memory_space<vmem>>, %arg7: memref<16x1xf32, #tpu.memory_space<vmem>>, %arg8: memref<16x1xf32, #tpu.memory_space<vmem>>, %arg9: memref<1x1xf32, #tpu.memory_space<vmem>>, %arg10: memref<1x128xf32, #tpu.memory_space<vmem>>) attributes {dimension_semantics = [#tpu.dimension_semantics<parallel>], iteration_bounds = array<i64: 1>, scalar_prefetch = 0 : i64, scratch_operands = 0 : i64, tpu.core_type = #tpu.core_type<tc>, window_params = [{transform_indices = @transform_0, window_bounds = array<i64: 8, 128>}, {pipeline_mode = #tpu.pipeline_mode<synchronous>, transform_indices = @transform_1, window_bounds = array<i64: 64, 8>}, {pipeline_mode = #tpu.pipeline_mode<synchronous>, transform_indices = @transform_2, window_bounds = array<i64: 64, 1>}, {pipeline_mode = #tpu.pipeline_mode<synchronous>, transform_indices = @transform_3, window_bounds = array<i64: 32, 64>}, {pipeline_mode = #tpu.pipeline_mode<synchronous>, transform_indices = @transform_4, window_bounds = array<i64: 32, 1>}, {pipeline_mode = #tpu.pipeline_mode<synchronous>, transform_indices = @transform_5, window_bounds = array<i64: 16, 32>}, {pipeline_mode = #tpu.pipeline_mode<synchronous>, transform_indices = @transform_6, window_bounds = array<i64: 16, 1>}, {pipeline_mode = #tpu.pipeline_mode<synchronous>, transform_indices = @transform_7, window_bounds = array<i64: 16, 1>}, {pipeline_mode = #tpu.pipeline_mode<synchronous>, transform_indices = @transform_8, window_bounds = array<i64: 1, 1>}, {transform_indices = @transform_9, window_bounds = array<i64: 1, 128>}]} {
    %c0 = arith.constant 0 : index
    %c0_0 = arith.constant 0 : index
    %0 = vector.load %arg2[%c0, %c0_0] : memref<64x8xf32, #tpu.memory_space<vmem>>, vector<64x8xf32>
    %c0_1 = arith.constant 0 : index
    %c0_2 = arith.constant 0 : index
    %1 = vector.load %arg1[%c0_1, %c0_2] : memref<8x128xf32, #tpu.memory_space<vmem>>, vector<8x128xf32>
    %cst = arith.constant dense<0.000000e+00> : vector<64x128xf32>
    %2 = tpu.matmul %0, %1, %cst {dimension_numbers = #tpu.dot_dimension_numbers<[1], [0], [0], [1], [0, 0, 1, 1], [], []>} : vector<64x8xf32>, vector<8x128xf32>, vector<64x128xf32> -> vector<64x128xf32>
    %c0_3 = arith.constant 0 : index
    %c0_4 = arith.constant 0 : index
    %3 = vector.load %arg3[%c0_3, %c0_4] : memref<64x1xf32, #tpu.memory_space<vmem>>, vector<64x1xf32>
    %4 = vector.broadcast %3 : vector<64x1xf32> to vector<64x128xf32>
    %5 = arith.addf %2, %4 : vector<64x128xf32>
    %cst_5 = arith.constant 0.000000e+00 : f32
    %6 = vector.broadcast %cst_5 : f32 to vector<64x128xf32>
    %7 = arith.maximumf %5, %6 : vector<64x128xf32>
    %c0_6 = arith.constant 0 : index
    %c0_7 = arith.constant 0 : index
    %8 = vector.load %arg4[%c0_6, %c0_7] : memref<32x64xf32, #tpu.memory_space<vmem>>, vector<32x64xf32>
    %cst_8 = arith.constant dense<0.000000e+00> : vector<32x128xf32>
    %9 = tpu.matmul %8, %7, %cst_8 {dimension_numbers = #tpu.dot_dimension_numbers<[1], [0], [0], [1], [0, 0, 1, 1], [], []>} : vector<32x64xf32>, vector<64x128xf32>, vector<32x128xf32> -> vector<32x128xf32>
    %c0_9 = arith.constant 0 : index
    %c0_10 = arith.constant 0 : index
    %10 = vector.load %arg5[%c0_9, %c0_10] : memref<32x1xf32, #tpu.memory_space<vmem>>, vector<32x1xf32>
    %11 = vector.broadcast %10 : vector<32x1xf32> to vector<32x128xf32>
    %12 = arith.addf %9, %11 : vector<32x128xf32>
    %cst_11 = arith.constant 0.000000e+00 : f32
    %13 = vector.broadcast %cst_11 : f32 to vector<32x128xf32>
    %14 = arith.maximumf %12, %13 : vector<32x128xf32>
    %c0_12 = arith.constant 0 : index
    %c0_13 = arith.constant 0 : index
    %15 = vector.load %arg6[%c0_12, %c0_13] : memref<16x32xf32, #tpu.memory_space<vmem>>, vector<16x32xf32>
    %cst_14 = arith.constant dense<0.000000e+00> : vector<16x128xf32>
    %16 = tpu.matmul %15, %14, %cst_14 {dimension_numbers = #tpu.dot_dimension_numbers<[1], [0], [0], [1], [0, 0, 1, 1], [], []>} : vector<16x32xf32>, vector<32x128xf32>, vector<16x128xf32> -> vector<16x128xf32>
    %c0_15 = arith.constant 0 : index
    %c0_16 = arith.constant 0 : index
    %17 = vector.load %arg7[%c0_15, %c0_16] : memref<16x1xf32, #tpu.memory_space<vmem>>, vector<16x1xf32>
    %18 = vector.broadcast %17 : vector<16x1xf32> to vector<16x128xf32>
    %19 = arith.addf %16, %18 : vector<16x128xf32>
    %cst_17 = arith.constant 0.000000e+00 : f32
    %20 = vector.broadcast %cst_17 : f32 to vector<16x128xf32>
    %21 = arith.maximumf %19, %20 : vector<16x128xf32>
    %c0_18 = arith.constant 0 : index
    %c0_19 = arith.constant 0 : index
    %22 = vector.load %arg8[%c0_18, %c0_19] : memref<16x1xf32, #tpu.memory_space<vmem>>, vector<16x1xf32>
    %23 = vector.broadcast %22 : vector<16x1xf32> to vector<16x128xf32>
    %24 = arith.mulf %21, %23 : vector<16x128xf32>
    %cst_20 = arith.constant dense<0.000000e+00> : vector<128xf32>
    %25 = vector.multi_reduction <add>, %24, %cst_20 [0] : vector<16x128xf32> to vector<128xf32>
    %26 = vector.shape_cast %25 : vector<128xf32> to vector<1x128xf32>
    %c0_21 = arith.constant 0 : index
    %c0_22 = arith.constant 0 : index
    %27 = vector.load %arg9[%c0_21, %c0_22] : memref<1x1xf32, #tpu.memory_space<vmem>>, vector<1x1xf32>
    %28 = vector.broadcast %27 : vector<1x1xf32> to vector<1x128xf32>
    %29 = arith.addf %26, %28 : vector<1x128xf32>
    %c0_23 = arith.constant 0 : index
    %c0_24 = arith.constant 0 : index
    %30 = vector.load %arg10[%c0_23, %c0_24] : memref<1x128xf32, #tpu.memory_space<vmem>>, vector<1x128xf32>
    tpu.vector_store %arg10[%c0_23, %c0_24], %29 {strides = array<i32>} : memref<1x128xf32, #tpu.memory_space<vmem>>, vector<1x128xf32>,
    return
  }
  func.func @transform_0(%arg0: i32) -> (i32, i32) {
    %c0_i32 = arith.constant 0 : i32
    %c0_i32_0 = arith.constant 0 : i32
    return %c0_i32, %arg0 : i32, i32
  }
  func.func @transform_1(%arg0: i32) -> (i32, i32) {
    %c0_i32 = arith.constant 0 : i32
    %c0_i32_0 = arith.constant 0 : i32
    %c0_i32_1 = arith.constant 0 : i32
    return %c0_i32, %c0_i32_0 : i32, i32
  }
  func.func @transform_2(%arg0: i32) -> (i32, i32) {
    %c0_i32 = arith.constant 0 : i32
    %c0_i32_0 = arith.constant 0 : i32
    %c0_i32_1 = arith.constant 0 : i32
    return %c0_i32, %c0_i32_0 : i32, i32
  }
  func.func @transform_3(%arg0: i32) -> (i32, i32) {
    %c0_i32 = arith.constant 0 : i32
    %c0_i32_0 = arith.constant 0 : i32
    %c0_i32_1 = arith.constant 0 : i32
    return %c0_i32, %c0_i32_0 : i32, i32
  }
  func.func @transform_4(%arg0: i32) -> (i32, i32) {
    %c0_i32 = arith.constant 0 : i32
    %c0_i32_0 = arith.constant 0 : i32
    %c0_i32_1 = arith.constant 0 : i32
    return %c0_i32, %c0_i32_0 : i32, i32
  }
  func.func @transform_5(%arg0: i32) -> (i32, i32) {
    %c0_i32 = arith.constant 0 : i32
    %c0_i32_0 = arith.constant 0 : i32
    %c0_i32_1 = arith.constant 0 : i32
    return %c0_i32, %c0_i32_0 : i32, i32
  }
  func.func @transform_6(%arg0: i32) -> (i32, i32) {
    %c0_i32 = arith.constant 0 : i32
    %c0_i32_0 = arith.constant 0 : i32
    %c0_i32_1 = arith.constant 0 : i32
    return %c0_i32, %c0_i32_0 : i32, i32
  }
  func.func @transform_7(%arg0: i32) -> (i32, i32) {
    %c0_i32 = arith.constant 0 : i32
    %c0_i32_0 = arith.constant 0 : i32
    %c0_i32_1 = arith.constant 0 : i32
    return %c0_i32, %c0_i32_0 : i32, i32
  }
  func.func @transform_8(%arg0: i32) -> (i32, i32) {
    %c0_i32 = arith.constant 0 : i32
    %c0_i32_0 = arith.constant 0 : i32
    %c0_i32_1 = arith.constant 0 : i32
    return %c0_i32, %c0_i32_0 : i32, i32
  }
  func.func @transform_9(%arg0: i32) -> (i32, i32) {
    %c0_i32 = arith.constant 0 : i32
    %c0_i32_0 = arith.constant 0 : i32
    return %c0_i32, %arg0 : i32, i32
  }
}

</mosaic_0001>

<bundles_post_ra>
// kernel: tpu_custom_call.1
= control target key start
LH: loop header
LB: loop body
LE: loop exit
PB: predicated region body
PF: predicated region fallthrough
CT: control target
= control target key end

     0   :  { %s784_s0 = inlined_call_operand.vmem [shape: f32[8,128], index: 0, kind: input, shape index: {}]   ;;  %s785_s1 = inlined_call_operand.vmem [shape: f32[64,8], index: 1, kind: input, shape index: {}]   ;;  %s786_s2 = inlined_call_operand.vmem [shape: f32[64,1], index: 2, kind: input, shape index: {}]   ;;  %s787_s3 = inlined_call_operand.vmem [shape: f32[32,64], index: 3, kind: input, shape index: {}]   ;;  %s788_s4 = inlined_call_operand.vmem [shape: f32[32,1], index: 4, kind: input, shape index: {}]   ;;  %s789_s5 = inlined_call_operand.vmem [shape: f32[16,32], index: 5, kind: input, shape index: {}]   ;;  %s790_s6 = inlined_call_operand.vmem [shape: f32[16,1], index: 6, kind: input, shape index: {}]   ;;  %s791_s7 = inlined_call_operand.vmem [shape: f32[16,1], index: 7, kind: input, shape index: {}]   ;;  %s792_s8 = inlined_call_operand.<no memory space> [shape: f32[1,1], index: 8, kind: input, shape index: {}]   ;;  %s793_s9 = inlined_call_operand.hbm [shape: f32[1,128], index: 9, kind: output, shape index: {}]  }
   0x1   :  { %v14_v0 = vstv %s792_s8 }
   0x2   :  { %15 = vst [vmem:[#allocation2] sm:$0x1] %v14_v0 }
   0x3   :  { %v43_v1 = vld [vmem:[%s784_s0] sm:$0xff]  ;;  %vm92_vm0 = vcmask 64512   ;;  %v36_v3 = vld [vmem:[%s785_s1 + $0x8] sm:$0xff]  ;;  %v37_v4 = vld [vmem:[%s785_s1 + $0x10] sm:$0xff]  ;;  %v619_v5 = vmov 0  }
   0x4   :  { %v35_v2 = vld [vmem:[%s785_s1] sm:$0xff]  ;;  %546 = vmatprep.subr.mxu0 %v43_v1  ;;  %595 = vset.pattern.permute.xlu0 %v619_v5  ;;  %v51_v6 = vld [vmem:[%s786_s2 + $0x38] sm:$0xff]  ;;  %v49_v7 = vld [vmem:[%s786_s2 + $0x28] sm:$0xff] }
   0x5   :  { %548 = vmatprep.mubr.msk.f32.mxu0 %vm92_vm0, %v35_v2  ;;  %547 = vmatpush3.msra.mxu0 %v43_v1  ;;  %v38_v8 = vld [vmem:[%s785_s1 + $0x18] sm:$0xff]  ;;  %v39_v9 = vld [vmem:[%s785_s1 + $0x20] sm:$0xff]  ;;  %v50_v10 = vld [vmem:[%s786_s2 + $0x30] sm:$0xff] }
   0x6   :  { %549 = vmatmul.mubr.msk.f32.vlgmr.msra.gmra.mxu0 %vm92_vm0, %v36_v3  ;;  %596 = vset.pattern.permute.xlu1 %v619_v5  ;;  %v48_v11 = vld [vmem:[%s786_s2 + $0x20] sm:$0xff]  ;;  %v40_v12 = vld [vmem:[%s785_s1 + $0x28] sm:$0xff] }
   0x7   :  { %551 = vmatprep.mubr.msk.f32.mxu0 %vm92_vm0, %v37_v4  ;;  %89 = vperm.xlu0 %595, %v51_v6  }
   0x8   :  { %79 = vperm.xlu1 %596, %v49_v7  }
   0xa   :  { %552 = vmatmul.mubr.msk.f32.gmra.mxu0 %vm92_vm0, %v38_v8 }
   0xb   :  { %554 = vmatprep.mubr.msk.f32.mxu0 %vm92_vm0, %v39_v9  ;;  %84 = vperm.xlu0 %595, %v50_v10  }
   0xc   :  { %16 = vsyncpa [#allocation4], 0  ;;  %v41_v13 = vld [vmem:[%s785_s1 + $0x30] sm:$0xff]  ;;  %v47_v14 = vld [vmem:[%s786_s2 + $0x18] sm:$0xff]  ;;  %74 = vperm.xlu1 %596, %v48_v11   ;;  %vm258_vm1 = vcmask 523264   ;;  %vm374_vm2 = vcmask 261120  }
   0xd   :  { %v46_v15 = vld [vmem:[%s786_s2 + $0x10] sm:$0xff]  ;;  %v42_v16 = vld [vmem:[%s785_s1 + $0x38] sm:$0xff]  ;;  %v45_v17 = vld [vmem:[%s786_s2 + $0x8] sm:$0xff] }
   0xe   :  { %555 = vmatmul.mubr.msk.f32.gmra.mxu0 %vm92_vm0, %v40_v12  ;;  %v44_v18 = vld [vmem:[%s786_s2] sm:$0xff]  ;;  %v237_v19 = vld [vmem:[%s788_s4 + $0x18] sm:$0xff]  ;;  %v236_v20 = vld [vmem:[%s788_s4 + $0x10] sm:$0xff] }
   0xf   :  { %557 = vmatprep.mubr.msk.f32.mxu0 %vm92_vm0, %v41_v13  ;;  %69 = vperm.xlu0 %595, %v47_v14   ;;  %v235_v21 = vld [vmem:[%s788_s4 + $0x8] sm:$0xff]  ;;  %v234_v22 = vld [vmem:[%s788_s4] sm:$0xff]  ;;  %v232_v62 = vld [vmem:[%s787_s3 + $0x10] sm:$0xff] }
  0x10   :  { %64 = vperm.xlu1 %596, %v46_v15   ;;  %v362_v23 = vld [vmem:[%s790_s6] sm:$0xff]  ;;  %v363_v24 = vld [vmem:[%s790_s6 + $0x8] sm:$0xff]  ;;  %v233_v63 = vld [vmem:[%s787_s3 + $0x18] sm:$0xff] }
  0x11   :  { %v458_v25 = vld [vmem:[%s791_s7] sm:$0xff]  ;;  %v459_v26 = vld [vmem:[%s791_s7 + $0x8] sm:$0xff] }
  0x12   :  { %558 = vmatmul.mubr.msk.f32.gmra.mxu0 %vm92_vm0, %v42_v16  ;;  %v479_v27 = vld [vmem:[#allocation2] sm:$0x1]  ;;  %v231_v61 = vld [vmem:[%s787_s3 + $0x8] sm:$0xff] }
  0x13   :  { %59 = vperm.xlu0 %595, %v45_v17   ;;  %v230_v28 = vld [vmem:[%s787_s3] sm:$0xff]  ;;  %v361_v17 = vld [vmem:[%s789_s5 + $0x8] sm:$0xff] }
  0x14   :  { %54 = vperm.xlu1 %596, %v44_v18   ;;  %576 = vmatprep.mubr.msk.f32.mxu1 %vm258_vm1, %v230_v28  ;;  %v360_v0 = vld [vmem:[%s789_s5] sm:$0xff]  ;;  %s620_s5 = smov [#allocation3]  }
  0x15   :  { %590 = vmatprep.mubr.msk.f32.mxu0 %vm374_vm2, %v360_v0  ;;  %s497_s19 = sshll.u32 %s620_s5, 4  ;;  %s498_s19 = int_to_ptr.vmem [resolvable:$true] %s497_s19 }
  0x16   :  { %s597_s20 = scalar_lea.vmem %s498_s19, 16  ;;  %s601_s21 = scalar_lea.vmem %s498_s19, 32 }
  0x17   :  { %255 = vperm.xlu0 %595, %v237_v19   ;;  %p598_p0 = scmp.ne.s32.totalorder %s498_s19, %s597_s20  ;;  %p602_p1 = scmp.lt.s32.totalorder %s498_s19, %s498_s19 }
  0x18   :  { %250 = vperm.xlu1 %596, %v236_v20   ;;  %p603_p2 = scmp.lt.s32.totalorder %s601_s21, %s597_s20 }
  0x1a   :  { %p604_p3 = por %p603_p2, %p602_p1 }
  0x1b   :  { %245 = vperm.xlu0 %595, %v235_v21  }
  0x1c   :  { %240 = vperm.xlu1 %596, %v234_v22   ;;  %p605_p4 = pnand %p604_p3, %p598_p0 }
  0x1f   :  { %366 = vperm.xlu0 %595, %v362_v23  }
  0x20   :  { %371 = vperm.xlu1 %596, %v363_v24  }
  0x23   :  { %462 = vperm.xlu0 %595, %v458_v25  }
  0x24   :  { %467 = vperm.xlu1 %596, %v459_v26  }
  0x27   :  { %482 = vperm.xlu0 %595, %v479_v27  }
  0x82   :  { %v90_v31 = vpop.permute.xlu0 %89 }
  0x83   :  { %v80_v33 = vpop.permute.xlu1 %79 }
  0x86   :  { %v85_v36 = vpop.permute.xlu0 %84 }
  0x87   :  { %v75_v38 = vpop.permute.xlu1 %74 }
  0x8a   :  { %v70_v45 = vpop.permute.xlu0 %69 }
  0x8b   :  { %v65_v48 = vpop.permute.xlu1 %64 }
  0x8e   :  { %v60_v53 = vpop.permute.xlu0 %59 }
  0x8f   :  { %v55_v56 = vpop.permute.xlu1 %54 }
  0x92   :  { %v256_v1 = vpop.permute.xlu0 %255 }
  0x93   :  { %v251_v3 = vpop.permute.xlu1 %250 }
  0x96   :  { %v246_v7 = vpop.permute.xlu0 %245 }
  0x97   :  { %v241_v12 = vpop.permute.xlu1 %240 }
  0x9a   :  { %v367_v18 = vpop.permute.xlu0 %366 }
  0x9b   :  { %v372_v19 = vpop.permute.xlu1 %371 }
  0x9e   :  { %v463_v26 = vpop.permute.xlu0 %462 }
  0x9f   :  { %v468_v27 = vpop.permute.xlu1 %467 }
  0xc6   :  { %v550_v29 = vpop.f32.mrf.mxu0 }
  0xc7   :  { %v189_v54 = vadd.f32 %v550_v29, %v60_v53 }
  0xc8   :  { %v183_v30 = vpop.f32.mrf.mxu0 }
  0xc9   :  { %v184_v57 = vadd.f32 %v183_v30, %v55_v56  ;;  %v223_v59 = vmax.f32 %v189_v54, 0.0  ;;  %v485_v30 = vlaneseq }
  0xca   :  { %v553_v32 = vpop.f32.mrf.mxu0 }
  0xcb   :  { %v199_v49 = vadd.f32 %v553_v32, %v70_v45  ;;  %v222_v60 = vmax.f32 %v184_v57, 0.0 }
  0xcc   :  { %v193_v34 = vpop.f32.mrf.mxu0 }
  0xcd   :  { %v194_v51 = vadd.f32 %v193_v34, %v65_v48  ;;  %v225_v55 = vmax.f32 %v199_v49, 0.0 }
  0xce   :  { %v556_v35 = vpop.f32.mrf.mxu0 }
  0xcf   :  { %v209_v42 = vadd.f32 %v556_v35, %v80_v33  ;;  %v224_v58 = vmax.f32 %v194_v51, 0.0  ;;  %v486_v33 = vshrl.u32 %v485_v30, 7 }
  0xd0   :  { %v203_v37 = vpop.f32.mrf.mxu0 }
  0xd1   :  { %v204_v46 = vadd.f32 %v203_v37, %v75_v38  ;;  %v227_v50 = vmax.f32 %v209_v42, 0.0  ;;  %v483_v38 = vpop.permute.xlu0 %482 }
  0xd2   :  { %v559_v39 = vpop.f32.mrf.mxu0 }
  0xd3   :  { %v219_v40 = vadd.f32 %v559_v39, %v90_v31  ;;  %v226_v52 = vmax.f32 %v204_v46, 0.0 }
  0xd4   :  { %v213_v41 = vpop.f32.mrf.mxu0 }
  0xd5   :  { %v229_v43 = vmax.f32 %v219_v40, 0.0  ;;  %v214_v44 = vadd.f32 %v213_v41, %v85_v36  ;;  %v487_v36 = vsub.s32 0, %v486_v33 }
  0xd7   :  { %v228_v47 = vmax.f32 %v214_v44, 0.0  ;;  %560 = vmatprep.subr.mxu1 %v229_v43  ;;  %v488_v40 = vrot.slane %v483_v38, %v487_v36 }
  0xd8   :  { %561 = vmatpush3.msra.mxu1 %v229_v43 }
  0xd9   :  { %562 = vmatprep.subr.mxu1 %v228_v47 }
  0xda   :  { %563 = vmatpush3.msra.mxu1 %v228_v47 }
  0xdb   :  { %564 = vmatprep.subr.mxu1 %v227_v50 }
  0xdc   :  { %565 = vmatpush3.msra.mxu1 %v227_v50 }
  0xdd   :  { %566 = vmatprep.subr.mxu1 %v226_v52 }
  0xde   :  { %567 = vmatpush3.msra.mxu1 %v226_v52 }
  0xdf   :  { %568 = vmatprep.subr.mxu1 %v225_v55 }
  0xe0   :  { %569 = vmatpush3.msra.mxu1 %v225_v55 }
  0xe1   :  { %570 = vmatprep.subr.mxu1 %v224_v58 }
  0xe2   :  { %571 = vmatpush3.msra.mxu1 %v224_v58 }
  0xe3   :  { %572 = vmatprep.subr.mxu1 %v223_v59 }
  0xe4   :  { %573 = vmatpush3.msra.mxu1 %v223_v59 }
  0xe5   :  { %574 = vmatprep.subr.mxu1 %v222_v60 }
  0xe6   :  { %575 = vmatpush3.msra.mxu1 %v222_v60 }
  0xe7   :  { %577 = vmatmul.mubr.msk.f32.vlgmr.msra.gmra.mxu1 %vm258_vm1, %v231_v61 }
  0xe8   :  { %579 = vmatprep.mubr.msk.f32.mxu1 %vm258_vm1, %v232_v62 }
  0xeb   :  { %580 = vmatmul.mubr.msk.f32.gmra.mxu1 %vm258_vm1, %v233_v63 }
 0x1a7   :  { %v578_v2 = vpop.f32.mrf.mxu1 }
 0x1a8   :  { %v343_v9 = vadd.f32 %v578_v2, %v246_v7 }
 0x1a9   :  { %v337_v4 = vpop.f32.mrf.mxu1 }
 0x1aa   :  { %v338_v13 = vadd.f32 %v337_v4, %v241_v12  ;;  %v357_v15 = vmax.f32 %v343_v9, 0.0 }
 0x1ab   :  { %v581_v5 = vpop.f32.mrf.mxu1 }
 0x1ac   :  { %v353_v6 = vadd.f32 %v581_v5, %v256_v1  ;;  %v356_v16 = vmax.f32 %v338_v13, 0.0 }
 0x1ad   :  { %v347_v8 = vpop.f32.mrf.mxu1 }
 0x1ae   :  { %v359_v10 = vmax.f32 %v353_v6, 0.0  ;;  %v348_v11 = vadd.f32 %v347_v8, %v251_v3 }
 0x1b0   :  { %v358_v14 = vmax.f32 %v348_v11, 0.0  ;;  %582 = vmatprep.subr.mxu0 %v359_v10 }
 0x1b1   :  { %583 = vmatpush3.msra.mxu0 %v359_v10 }
 0x1b2   :  { %584 = vmatprep.subr.mxu0 %v358_v14 }
 0x1b3   :  { %585 = vmatpush3.msra.mxu0 %v358_v14 }
 0x1b4   :  { %586 = vmatprep.subr.mxu0 %v357_v15 }
 0x1b5   :  { %587 = vmatpush3.msra.mxu0 %v357_v15 }
 0x1b6   :  { %588 = vmatprep.subr.mxu0 %v356_v16 }
 0x1b7   :  { %589 = vmatpush3.msra.mxu0 %v356_v16 }
 0x1b8   :  { %591 = vmatmul.mubr.msk.f32.vlgmr.msra.gmra.mxu0 %vm374_vm2, %v361_v17 }
 0x278   :  { %v592_v20 = vpop.f32.mrf.mxu0 }
 0x279   :  { %v453_v21 = vadd.f32 %v592_v20, %v372_v19 }
 0x27a   :  { %v447_v22 = vpop.f32.mrf.mxu0 }
 0x27b   :  { %v457_v23 = vmax.f32 %v453_v21, 0.0  ;;  %v448_v24 = vadd.f32 %v447_v22, %v367_v18 }
 0x27d   :  { %v456_v25 = vmax.f32 %v448_v24, 0.0  ;;  %v471_v28 = vmul.f32 %v468_v27, %v457_v23 }
 0x27f   :  { %v470_v29 = vmul.f32 %v463_v26, %v456_v25 }
 0x281   :  { %v472_v31 = vadd.f32 %v471_v28, %v470_v29 }
 0x283   :  { %v473_v32 = vrot.slane %v472_v31, 4 }
 0x285   :  { %v474_v34 = vadd.f32 %v473_v32, %v472_v31 }
 0x287   :  { %v475_v35 = vrot.slane %v474_v34, 2 }
 0x289   :  { %v476_v37 = vadd.f32 %v475_v35, %v474_v34 }
 0x28b   :  { %v477_v39 = vrot.slane %v476_v37, 1 }
 0x28d   :  { %v478_v41 = vadd.f32 %v477_v39, %v476_v37 }
 0x28f   :  { %v489_v42 = vadd.f32 %v488_v40, %v478_v41 }
 0x291   :  { %490 = vst [vmem:[#allocation3] sm:$0x1] %v489_v42 }
 0x292   :  { %608 = shalt.err (!%p605_p4)
}
 0x293   :  { %500 = dma.vmem_to_hbm [thread:$0]  %s498_s19, 16, %s793_s9, [#allocation4]  }
 0x294   :  { %617 = dma.done.wait [#allocation4], 16  }
 0x295   :  { %618 = vsyncadd [#allocation4], 4294967280 }
 0x296   :  { %504 = vsyncpa [#allocation4], 1 }

</bundles_post_ra>
